<compile_context>
chip_gen: v7x
topology: tpu7x:2x2x1
jax: 0.10.0
libtpu: 0.0.40
codegen_flags: <defaults>
</compile_context>

<pallas_src>
import numpy as np

import jax
import jax.numpy as jnp
from jax.experimental import pallas as pl
from jax.experimental.pallas import tpu as pltpu

LOW_BOUND = 40
HIGH_BOUND = 150
FPS = 30
CLIP_LENGTH = 256                    # module default clip_length / time_length
F_BINS = HIGH_BOUND - LOW_BOUND      # 110 useful frequency bins
F_PAD = 128                          # lane-padded frequency bins
PI = 3.14159265                      # matches the module's self.pi


def _sp_kernel(wave_ref, basis_ref, target_ref, loss_ref, idx_ref):
    # wave_ref  : (TB, T)        predicted wave rows for this tile
    # basis_ref : (T, 2*F_PAD)   hanning-windowed [sin | cos] basis (resident)
    # target_ref: (TB, 1) int32  CE target bin per row (0 for padded rows)
    # loss_ref  : (TB, 1) f32    per-row cross-entropy: logsumexp - picked logit
    # idx_ref   : (TB, 1) int32  argmax frequency bin in [0, F_BINS)
    proj = jnp.dot(wave_ref[...], basis_ref[...],
                   preferred_element_type=jnp.float32)      # (TB, 2*F_PAD)  one MXU pass
    s = proj[:, :F_PAD]
    c = proj[:, F_PAD:]
    ca = s * s + c * c                                       # (TB, F_PAD) power spectrum, f32
                                                             # (zero in padded lanes)

    lane = jax.lax.broadcasted_iota(jnp.int32, ca.shape, 1)
    valid = lane < F_BINS
    masked = jnp.where(valid, ca, -jnp.inf)

    # row max + first-occurrence argmax over the 110 valid bins (XLU reductions)
    row_max = jnp.max(masked, axis=1, keepdims=True)         # (TB, 1)
    cand = jnp.where(masked == row_max, lane.astype(jnp.float32), float(F_PAD))
    idx_ref[...] = jnp.min(cand, axis=1, keepdims=True).astype(jnp.int32)

    # stable logsumexp over valid bins (ca - row_max <= 0, no overflow)
    ex = jnp.where(valid, jnp.exp(ca - row_max), 0.0)
    lse = row_max + jnp.log(jnp.sum(ex, axis=1, keepdims=True))

    # picked target logit via lane == target compare (no one-hot operand)
    picked = jnp.sum(jnp.where(lane == target_ref[...], ca, 0.0),
                     axis=1, keepdims=True)
    loss_ref[...] = lse - picked


def _build_basis(T):
    """Hanning-windowed [sin | cos] basis, lane-padded from F_BINS to F_PAD.

    Same math as the torch buffers in SP_loss.__init__ (the module also uses
    np.hanning), with the window folded into the basis so the kernel needs no
    separate (1,T) operand or VPU pre-multiply.
    """
    bpm_range = np.arange(LOW_BOUND, HIGH_BOUND, dtype=np.float32) / np.float32(60.0)
    f_t = bpm_range / np.float32(FPS)                                     # (F,)
    two_pi_n = np.float32(2.0 * PI) * np.arange(0, T, dtype=np.float32)   # (T,)
    phase = np.outer(two_pi_n, f_t).astype(np.float32)                    # (T, F)
    hanning = np.hanning(T).astype(np.float32).reshape(T, 1)
    basis = np.zeros((T, 2 * F_PAD), dtype=np.float32)
    basis[:, :F_BINS] = hanning * np.sin(phase)
    basis[:, F_PAD:F_PAD + F_BINS] = hanning * np.cos(phase)
    return jnp.asarray(basis)


def sp_loss_forward(wave_pr, gt, clip_length=CLIP_LENGTH, use_bf16_operands=False):
    """Reproduces SP_loss.forward with loss_type=1 (pred=None, flag=None).

    wave_pr: (B, T) float32, T == clip_length
    gt     : (B,)   float32 heart rates (bpm)
    returns (loss scalar float32, whole_max_idx (B,) int32)
    """
    wave_pr = jnp.asarray(wave_pr, jnp.float32)
    gt = jnp.asarray(gt, jnp.float32)
    B, T = wave_pr.shape
    assert T == clip_length

    basis = _build_basis(T)                                            # (T, 2*F_PAD)

    # gt clamping + integer CE target (tiny (B,)-sized glue in XLA)
    hr = jnp.where(gt >= HIGH_BOUND, float(HIGH_BOUND - 1), gt)
    hr = jnp.where(hr <= LOW_BOUND, float(LOW_BOUND), hr)
    target = (hr - LOW_BOUND).astype(jnp.int32)                        # (B,)

    # batch tiling: TB rows per grid step (multiple of 8), pad B up to a TB multiple
    TB = min(256, ((B + 7) // 8) * 8)
    b_pad = ((B + TB - 1) // TB) * TB
    if b_pad != B:
        wave_pr = jnp.pad(wave_pr, ((0, b_pad - B), (0, 0)))
        target = jnp.pad(target, (0, b_pad - B))
    target_col = target[:, None]                                       # (b_pad, 1) int32

    if use_bf16_operands:
        # Opt-in only: ~1e-3 relative deviation vs. the f32 torch reference
        # (accumulation stays f32; ca/epilogue stay f32 so argmax semantics hold).
        wave_in = wave_pr.astype(jnp.bfloat16)
        basis_in = basis.astype(jnp.bfloat16)
    else:
        wave_in, basis_in = wave_pr, basis

    grid = (b_pad // TB,)
    grid_spec = pltpu.PrefetchScalarGridSpec(
        num_scalar_prefetch=0,
        grid=grid,
        in_specs=[
            pl.BlockSpec((TB, T), lambda i: (i, 0)),
            pl.BlockSpec((T, 2 * F_PAD), lambda i: (0, 0)),   # resident across steps
            pl.BlockSpec((TB, 1), lambda i: (i, 0)),
        ],
        out_specs=[
            pl.BlockSpec((TB, 1), lambda i: (i, 0)),
            pl.BlockSpec((TB, 1), lambda i: (i, 0)),
        ],
    )
    itemsize = 2 if use_bf16_operands else 4
    cost = pl.CostEstimate(
        flops=2 * b_pad * T * (2 * F_PAD) + 10 * b_pad * F_PAD,
        transcendentals=b_pad * (F_PAD + 1),
        bytes_accessed=(b_pad * T + T * 2 * F_PAD) * itemsize + b_pad * 12,
    )
    loss_rows, max_bin = pl.pallas_call(
        _sp_kernel,
        out_shape=(
            jax.ShapeDtypeStruct((b_pad, 1), jnp.float32),
            jax.ShapeDtypeStruct((b_pad, 1), jnp.int32),
        ),
        grid_spec=grid_spec,
        compiler_params=pltpu.CompilerParams(
            dimension_semantics=("parallel",)),
        cost_estimate=cost,
    )(wave_in, basis_in, target_col)

    loss = jnp.mean(loss_rows[:B, 0])          # nn.CrossEntropyLoss mean reduction
    whole_max_idx = max_bin[:B, 0] + LOW_BOUND
    return loss, whole_max_idx
    # TODO(synk): loss_type==7 / pred-rescaling branch of the module is not
    # implemented (default forward uses loss_type=1, pred=None).


if __name__ == "__main__":
    key = jax.random.PRNGKey(0)
    k_wave, k_gt = jax.random.split(key)

    B = 2
    T = CLIP_LENGTH  # 256, per module default
    wave_pr = jax.random.normal(k_wave, (B, T), dtype=jnp.float32)
    # gt heart rates in bpm, including values that exercise the clamping path
    gt = jax.random.uniform(k_gt, (B,), minval=30.0, maxval=170.0, dtype=jnp.float32)

    loss, whole_max_idx = jax.jit(sp_loss_forward)(wave_pr, gt)
    loss = jax.block_until_ready(loss)
    whole_max_idx = jax.block_until_ready(whole_max_idx)

    assert loss.shape == () and bool(jnp.isfinite(loss))
    assert whole_max_idx.shape == (B,)
    assert bool(jnp.all(whole_max_idx >= LOW_BOUND)) and bool(
        jnp.all(whole_max_idx < HIGH_BOUND))

    print("KERNEL_OK")
</pallas_src>

<mosaic_0001>
module attributes {stable_mosaic.version = 11 : i64} {
  func.func @_sp_kernel(%arg0: i32, %arg1: memref<8x256xf32, #tpu.memory_space<vmem>>, %arg2: memref<256x256xf32, #tpu.memory_space<vmem>>, %arg3: memref<8x1xi32, #tpu.memory_space<vmem>>, %arg4: memref<8x1xf32, #tpu.memory_space<vmem>>, %arg5: memref<8x1xi32, #tpu.memory_space<vmem>>) attributes {dimension_semantics = [#tpu.dimension_semantics<parallel>], iteration_bounds = array<i64: 1>, scalar_prefetch = 0 : i64, scratch_operands = 0 : i64, tpu.core_type = #tpu.core_type<tc>, window_params = [{transform_indices = @transform_0, window_bounds = array<i64: 8, 256>}, {pipeline_mode = #tpu.pipeline_mode<synchronous>, transform_indices = @transform_1, window_bounds = array<i64: 256, 256>}, {transform_indices = @transform_2, window_bounds = array<i64: 8, 1>}, {transform_indices = @transform_3, window_bounds = array<i64: 8, 1>}, {transform_indices = @transform_4, window_bounds = array<i64: 8, 1>}]} {
    %c0 = arith.constant 0 : index
    %c0_0 = arith.constant 0 : index
    %0 = vector.load %arg1[%c0, %c0_0] : memref<8x256xf32, #tpu.memory_space<vmem>>, vector<8x256xf32>
    %c0_1 = arith.constant 0 : index
    %c0_2 = arith.constant 0 : index
    %1 = vector.load %arg2[%c0_1, %c0_2] : memref<256x256xf32, #tpu.memory_space<vmem>>, vector<256x256xf32>
    %cst = arith.constant dense<0.000000e+00> : vector<8x256xf32>
    %2 = tpu.matmul %0, %1, %cst {dimension_numbers = #tpu.dot_dimension_numbers<[1], [0], [0], [1], [0, 0, 1, 1], [], []>} : vector<8x256xf32>, vector<256x256xf32>, vector<8x256xf32> -> vector<8x256xf32>
    %3 = vector.extract_strided_slice %2 {offsets = [0, 0], sizes = [8, 128], strides = [1, 1]} : vector<8x256xf32> to vector<8x128xf32>
    %4 = vector.extract_strided_slice %2 {offsets = [0, 128], sizes = [8, 128], strides = [1, 1]} : vector<8x256xf32> to vector<8x128xf32>
    %5 = arith.mulf %3, %3 : vector<8x128xf32>
    %6 = arith.mulf %4, %4 : vector<8x128xf32>
    %7 = arith.addf %5, %6 : vector<8x128xf32>
    %8 = tpu.iota {dimensions = array<i32: 1>} : vector<8x128xi32>
    %c110_i32 = arith.constant 110 : i32
    %9 = vector.broadcast %c110_i32 : i32 to vector<8x128xi32>
    %10 = arith.cmpi slt, %8, %9 : vector<8x128xi32>
    %cst_3 = arith.constant 0xFF800000 : f32
    %11 = vector.broadcast %cst_3 : f32 to vector<8x128xf32>
    %12 = arith.select %10, %7, %11 : vector<8x128xi1>, vector<8x128xf32>
    %cst_4 = arith.constant dense<0xFF800000> : vector<8xf32>
    %13 = vector.multi_reduction <maximumf>, %12, %cst_4 [1] : vector<8x128xf32> to vector<8xf32>
    %14 = vector.shape_cast %13 : vector<8xf32> to vector<8x1xf32>
    %15 = vector.broadcast %14 : vector<8x1xf32> to vector<8x128xf32>
    %16 = arith.cmpf oeq, %12, %15 : vector<8x128xf32>
    %17 = arith.sitofp %8 : vector<8x128xi32> to vector<8x128xf32>
    %cst_5 = arith.constant 1.280000e+02 : f32
    %18 = vector.broadcast %cst_5 : f32 to vector<8x128xf32>
    %19 = arith.select %16, %17, %18 : vector<8x128xi1>, vector<8x128xf32>
    %cst_6 = arith.constant dense<0x7F800000> : vector<8xf32>
    %20 = vector.multi_reduction <minimumf>, %19, %cst_6 [1] : vector<8x128xf32> to vector<8xf32>
    %21 = vector.shape_cast %20 : vector<8xf32> to vector<8x1xf32>
    %22 = arith.fptosi %21 : vector<8x1xf32> to vector<8x1xi32>
    %c0_7 = arith.constant 0 : index
    %c0_8 = arith.constant 0 : index
    %23 = vector.load %arg5[%c0_7, %c0_8] : memref<8x1xi32, #tpu.memory_space<vmem>>, vector<8x1xi32>
    tpu.vector_store %arg5[%c0_7, %c0_8], %22 {strides = array<i32>} : memref<8x1xi32, #tpu.memory_space<vmem>>, vector<8x1xi32>,
    %24 = vector.broadcast %14 : vector<8x1xf32> to vector<8x128xf32>
    %25 = arith.subf %7, %24 : vector<8x128xf32>
    %26 = math.exp %25 : vector<8x128xf32>
    %cst_9 = arith.constant 0.000000e+00 : f32
    %27 = vector.broadcast %cst_9 : f32 to vector<8x128xf32>
    %28 = arith.select %10, %26, %27 : vector<8x128xi1>, vector<8x128xf32>
    %cst_10 = arith.constant dense<0.000000e+00> : vector<8xf32>
    %29 = vector.multi_reduction <add>, %28, %cst_10 [1] : vector<8x128xf32> to vector<8xf32>
    %30 = vector.shape_cast %29 : vector<8xf32> to vector<8x1xf32>
    %31 = math.log %30 : vector<8x1xf32>
    %32 = arith.addf %14, %31 : vector<8x1xf32>
    %c0_11 = arith.constant 0 : index
    %c0_12 = arith.constant 0 : index
    %33 = vector.load %arg3[%c0_11, %c0_12] : memref<8x1xi32, #tpu.memory_space<vmem>>, vector<8x1xi32>
    %34 = vector.broadcast %33 : vector<8x1xi32> to vector<8x128xi32>
    %35 = arith.cmpi eq, %8, %34 : vector<8x128xi32>
    %cst_13 = arith.constant 0.000000e+00 : f32
    %36 = vector.broadcast %cst_13 : f32 to vector<8x128xf32>
    %37 = arith.select %35, %7, %36 : vector<8x128xi1>, vector<8x128xf32>
    %cst_14 = arith.constant dense<0.000000e+00> : vector<8xf32>
    %38 = vector.multi_reduction <add>, %37, %cst_14 [1] : vector<8x128xf32> to vector<8xf32>
    %39 = vector.shape_cast %38 : vector<8xf32> to vector<8x1xf32>
    %40 = arith.subf %32, %39 : vector<8x1xf32>
    %c0_15 = arith.constant 0 : index
    %c0_16 = arith.constant 0 : index
    %41 = vector.load %arg4[%c0_15, %c0_16] : memref<8x1xf32, #tpu.memory_space<vmem>>, vector<8x1xf32>
    tpu.vector_store %arg4[%c0_15, %c0_16], %40 {strides = array<i32>} : memref<8x1xf32, #tpu.memory_space<vmem>>, vector<8x1xf32>,
    return
  }
  func.func @transform_0(%arg0: i32) -> (i32, i32) {
    %c0_i32 = arith.constant 0 : i32
    %c0_i32_0 = arith.constant 0 : i32
    return %arg0, %c0_i32 : i32, i32
  }
  func.func @transform_1(%arg0: i32) -> (i32, i32) {
    %c0_i32 = arith.constant 0 : i32
    %c0_i32_0 = arith.constant 0 : i32
    %c0_i32_1 = arith.constant 0 : i32
    return %c0_i32, %c0_i32_0 : i32, i32
  }
  func.func @transform_2(%arg0: i32) -> (i32, i32) {
    %c0_i32 = arith.constant 0 : i32
    %c0_i32_0 = arith.constant 0 : i32
    return %arg0, %c0_i32 : i32, i32
  }
  func.func @transform_3(%arg0: i32) -> (i32, i32) {
    %c0_i32 = arith.constant 0 : i32
    %c0_i32_0 = arith.constant 0 : i32
    return %arg0, %c0_i32 : i32, i32
  }
  func.func @transform_4(%arg0: i32) -> (i32, i32) {
    %c0_i32 = arith.constant 0 : i32
    %c0_i32_0 = arith.constant 0 : i32
    return %arg0, %c0_i32 : i32, i32
  }
}

</mosaic_0001>

<bundles_post_ra>
// kernel: sp_loss_forward.1
= control target key start
LH: loop header
LB: loop body
LE: loop exit
PB: predicated region body
PF: predicated region fallthrough
CT: control target
= control target key end

     0   :  { %10 = vsyncpa [#allocation3], 0  ;;  %s311_s15 = smov [#allocation2]   ;;  %s367_s0 = inlined_call_operand.vmem [shape: f32[8,256], index: 0, kind: input, shape index: {}]   ;;  %s368_s1 = inlined_call_operand.hbm [shape: f32[256,256], index: 1, kind: input, shape index: {}]   ;;  %s369_s2 = inlined_call_operand.vmem [shape: s32[8,1], index: 2, kind: input, shape index: {}]   ;;  %s370_s3 = inlined_call_operand.vmem [shape: f32[8,1], index: 3, kind: output, shape index: {0}]   ;;  %s371_s4 = inlined_call_operand.vmem [shape: s32[8,1], index: 4, kind: output, shape index: {1}]  }
   0x1   :  { %s18_s16 = sshll.u32 %s311_s15, 4  ;;  %s287_s19 = scalar_lea.hbm %s368_s1, 8192  ;;  %s19_s16 = int_to_ptr.vmem [resolvable:$true] %s18_s16 }
   0x2   :  { %p288_p0 = scmp.ne.s32.totalorder %s368_s1, %s287_s19  ;;  %p291_p1 = scmp.lt.u32.totalorder %s287_s19, %s368_s1 }
   0x4   :  { %p293_p2 = pnand %p291_p1, %p288_p0 }
   0x6   :  { %296 = shalt.err (!%p293_p2)
}
   0x7   :  { %s297_s24 = scalar_lea.vmem %s19_s16, 8192  ;;  %p302_p4 = scmp.lt.s32.totalorder %s19_s16, %s19_s16 }
   0x8   :  { %p298_p3 = scmp.ne.s32.totalorder %s19_s16, %s297_s24  ;;  %p303_p5 = scmp.lt.s32.totalorder %s297_s24, %s297_s24 }
   0xa   :  { %p304_p6 = por %p303_p5, %p302_p4 }
   0xc   :  { %p305_p7 = pnand %p304_p6, %p298_p3 }
   0xe   :  { %308 = shalt.err (!%p305_p7)
}
   0xf   :  { %s312_s25 = smov 256   ;;  %s313_s26 = smov 16  }
  0x10   :  { %24 = dma.hbm_to_vmem [thread:$0]  %s368_s1, 8192, %s19_s16, [#allocation3], %s312_s25, %s312_s25, %s313_s26  }
  0x11   :  { %309 = dma.done.wait [#allocation3], 8192  }
  0x12   :  { %310 = vsyncadd [#allocation3], 4294959104  ;;  %v33_v0 = vld [vmem:[#allocation2 + $0x8] sm:$0xff]  ;;  %v35_v1 = vld [vmem:[#allocation2 + $0x18] sm:$0xff]  ;;  %vm182_vm3 = vcmask 7168  }
  0x13   :  { %v32_v2 = vld [vmem:[#allocation2] sm:$0xff]  ;;  %v212_v3 = vpack.c.bf16 %v35_v1, %v33_v0  ;;  %v34_v4 = vld [vmem:[#allocation2 + $0x10] sm:$0xff]  ;;  %v37_v5 = vld [vmem:[#allocation2 + $0x28] sm:$0xff] }
  0x14   :  { %v39_v6 = vld [vmem:[#allocation2 + $0x38] sm:$0xff]  ;;  %v214_v7 = vpack.c.bf16 %v34_v4, %v32_v2  ;;  %v36_v9 = vld [vmem:[#allocation2 + $0x20] sm:$0xff]  ;;  %v38_v10 = vld [vmem:[#allocation2 + $0x30] sm:$0xff] }
  0x15   :  { %v216_v8 = vpack.c.bf16 %v39_v6, %v37_v5  ;;  %v41_v11 = vld [vmem:[#allocation2 + $0x48] sm:$0xff]  ;;  %213 = vmatprep.subr.bf16.mxu0 %v212_v3  ;;  %v43_v12 = vld [vmem:[#allocation2 + $0x58] sm:$0xff]  ;;  %v218_v13 = vpack.c.bf16 %v38_v10, %v36_v9  ;;  %v40_v15 = vld [vmem:[#allocation2 + $0x40] sm:$0xff] }
  0x16   :  { %215 = vmatpush1.bf16.msra.mxu0 %v214_v7  ;;  %v220_v14 = vpack.c.bf16 %v43_v12, %v41_v11  ;;  %v42_v16 = vld [vmem:[#allocation2 + $0x50] sm:$0xff]  ;;  %v45_v17 = vld [vmem:[#allocation2 + $0x68] sm:$0xff]  ;;  %v47_v18 = vld [vmem:[#allocation2 + $0x78] sm:$0xff] }
  0x17   :  { %217 = vmatprep.subr.bf16.mxu0 %v216_v8  ;;  %v222_v19 = vpack.c.bf16 %v42_v16, %v40_v15  ;;  %v224_v20 = vpack.c.bf16 %v47_v18, %v45_v17  ;;  %v44_v21 = vld [vmem:[#allocation2 + $0x60] sm:$0xff]  ;;  %v46_v22 = vld [vmem:[#allocation2 + $0x70] sm:$0xff]  ;;  %v49_v23 = vld [vmem:[#allocation2 + $0x88] sm:$0xff] }
  0x18   :  { %v51_v24 = vld [vmem:[#allocation2 + $0x98] sm:$0xff]  ;;  %v226_v25 = vpack.c.bf16 %v46_v22, %v44_v21  ;;  %v48_v27 = vld [vmem:[#allocation2 + $0x80] sm:$0xff]  ;;  %v50_v28 = vld [vmem:[#allocation2 + $0x90] sm:$0xff] }
  0x19   :  { %v228_v26 = vpack.c.bf16 %v51_v24, %v49_v23  ;;  %v53_v29 = vld [vmem:[#allocation2 + $0xa8] sm:$0xff]  ;;  %v55_v30 = vld [vmem:[#allocation2 + $0xb8] sm:$0xff]  ;;  %v230_v31 = vpack.c.bf16 %v50_v28, %v48_v27  ;;  %v52_v33 = vld [vmem:[#allocation2 + $0xa0] sm:$0xff] }
  0x1a   :  { %219 = vmatpush1.bf16.msra.mxu0 %v218_v13  ;;  %v232_v32 = vpack.c.bf16 %v55_v30, %v53_v29  ;;  %v54_v34 = vld [vmem:[#allocation2 + $0xb0] sm:$0xff]  ;;  %v57_v35 = vld [vmem:[#allocation2 + $0xc8] sm:$0xff]  ;;  %v59_v36 = vld [vmem:[#allocation2 + $0xd8] sm:$0xff] }
  0x1b   :  { %221 = vmatprep.subr.bf16.mxu0 %v220_v14  ;;  %v234_v37 = vpack.c.bf16 %v54_v34, %v52_v33  ;;  %v236_v38 = vpack.c.bf16 %v59_v36, %v57_v35  ;;  %v56_v39 = vld [vmem:[#allocation2 + $0xc0] sm:$0xff]  ;;  %v58_v40 = vld [vmem:[#allocation2 + $0xd0] sm:$0xff]  ;;  %v31_v41 = vld [vmem:[%s367_s0 + $0x8] sm:$0xff]  ;;  %v314_v34 = vmov 0   ;;  %v170_v35 = vlaneseq }
  0x1c   :  { %v61_v42 = vld [vmem:[#allocation2 + $0xe8] sm:$0xff]  ;;  %v63_v43 = vld [vmem:[#allocation2 + $0xf8] sm:$0xff]  ;;  %160 = vmatprep.mubr.f32.mxu0 %v31_v41  ;;  %v238_v44 = vpack.c.bf16 %v58_v40, %v56_v39  ;;  %v60_v46 = vld [vmem:[#allocation2 + $0xe0] sm:$0xff]  ;;  %282 = vset.pattern.permute.xlu0 %v314_v34 }
  0x1d   :  { %v240_v45 = vpack.c.bf16 %v63_v43, %v61_v42  ;;  %v62_v47 = vld [vmem:[#allocation2 + $0xf0] sm:$0xff]  ;;  %v65_v48 = vld [vmem:[#allocation2 + $0x108] sm:$0xff]  ;;  %v67_v49 = vld [vmem:[#allocation2 + $0x118] sm:$0xff]  ;;  %v171_v36 = vand.u32 127, %v170_v35 }
  0x1e   :  { %223 = vmatpush1.bf16.msra.mxu0 %v222_v19  ;;  %v242_v50 = vpack.c.bf16 %v62_v47, %v60_v46  ;;  %v244_v51 = vpack.c.bf16 %v67_v49, %v65_v48  ;;  %v64_v52 = vld [vmem:[#allocation2 + $0x100] sm:$0xff]  ;;  %v66_v53 = vld [vmem:[#allocation2 + $0x110] sm:$0xff]  ;;  %v69_v54 = vld [vmem:[#allocation2 + $0x128] sm:$0xff] }
  0x1f   :  { %225 = vmatprep.subr.bf16.mxu0 %v224_v20  ;;  %v71_v55 = vld [vmem:[#allocation2 + $0x138] sm:$0xff]  ;;  %v246_v56 = vpack.c.bf16 %v66_v53, %v64_v52  ;;  %v68_v58 = vld [vmem:[#allocation2 + $0x120] sm:$0xff]  ;;  %v70_v59 = vld [vmem:[#allocation2 + $0x130] sm:$0xff]  ;;  %vm172_vm0 = vcmp.lt.s32.totalorder %v171_v36, 110  ;;  %v177_v49 = vcvt.s32.f32 %v171_v36 }
  0x20   :  { %v248_v57 = vpack.c.bf16 %v71_v55, %v69_v54  ;;  %v73_v60 = vld [vmem:[#allocation2 + $0x148] sm:$0xff]  ;;  %v75_v61 = vld [vmem:[#allocation2 + $0x158] sm:$0xff]  ;;  %v250_v62 = vpack.c.bf16 %v70_v59, %v68_v58  ;;  %v72_v0 = vld [vmem:[#allocation2 + $0x140] sm:$0xff] }
  0x21   :  { %v252_v63 = vpack.c.bf16 %v75_v61, %v73_v60  ;;  %v74_v1 = vld [vmem:[#allocation2 + $0x150] sm:$0xff]  ;;  %v77_v2 = vld [vmem:[#allocation2 + $0x168] sm:$0xff]  ;;  %v79_v3 = vld [vmem:[#allocation2 + $0x178] sm:$0xff] }
  0x22   :  { %227 = vmatpush1.bf16.msra.mxu0 %v226_v25  ;;  %v254_v4 = vpack.c.bf16 %v74_v1, %v72_v0  ;;  %v256_v5 = vpack.c.bf16 %v79_v3, %v77_v2  ;;  %v76_v6 = vld [vmem:[#allocation2 + $0x160] sm:$0xff]  ;;  %v78_v7 = vld [vmem:[#allocation2 + $0x170] sm:$0xff]  ;;  %v81_v8 = vld [vmem:[#allocation2 + $0x188] sm:$0xff] }
  0x23   :  { %229 = vmatprep.subr.bf16.mxu0 %v228_v26  ;;  %v83_v9 = vld [vmem:[#allocation2 + $0x198] sm:$0xff]  ;;  %v258_v10 = vpack.c.bf16 %v78_v7, %v76_v6  ;;  %v80_v12 = vld [vmem:[#allocation2 + $0x180] sm:$0xff]  ;;  %v82_v13 = vld [vmem:[#allocation2 + $0x190] sm:$0xff] }
  0x24   :  { %v260_v11 = vpack.c.bf16 %v83_v9, %v81_v8  ;;  %v85_v14 = vld [vmem:[#allocation2 + $0x1a8] sm:$0xff]  ;;  %v87_v15 = vld [vmem:[#allocation2 + $0x1b8] sm:$0xff]  ;;  %v262_v16 = vpack.c.bf16 %v82_v13, %v80_v12  ;;  %v84_v18 = vld [vmem:[#allocation2 + $0x1a0] sm:$0xff] }
  0x25   :  { %v264_v17 = vpack.c.bf16 %v87_v15, %v85_v14  ;;  %v86_v19 = vld [vmem:[#allocation2 + $0x1b0] sm:$0xff]  ;;  %v89_v20 = vld [vmem:[#allocation2 + $0x1c8] sm:$0xff]  ;;  %v91_v21 = vld [vmem:[#allocation2 + $0x1d8] sm:$0xff] }
  0x26   :  { %231 = vmatpush1.bf16.msra.mxu0 %v230_v31  ;;  %v266_v22 = vpack.c.bf16 %v86_v19, %v84_v18  ;;  %v268_v23 = vpack.c.bf16 %v91_v21, %v89_v20  ;;  %v88_v24 = vld [vmem:[#allocation2 + $0x1c0] sm:$0xff]  ;;  %v90_v25 = vld [vmem:[#allocation2 + $0x1d0] sm:$0xff]  ;;  %v93_v26 = vld [vmem:[#allocation2 + $0x1e8] sm:$0xff] }
  0x27   :  { %233 = vmatprep.subr.bf16.mxu0 %v232_v32  ;;  %v95_v27 = vld [vmem:[#allocation2 + $0x1f8] sm:$0xff]  ;;  %v270_v28 = vpack.c.bf16 %v90_v25, %v88_v24  ;;  %v92_v30 = vld [vmem:[#allocation2 + $0x1e0] sm:$0xff]  ;;  %v94_v31 = vld [vmem:[#allocation2 + $0x1f0] sm:$0xff] }
  0x28   :  { %v272_v29 = vpack.c.bf16 %v95_v27, %v93_v26  ;;  %v274_v32 = vpack.c.bf16 %v94_v31, %v92_v30  ;;  %v30_v33 = vld [vmem:[%s367_s0] sm:$0xff] }
  0x29   :  { %v193_v43 = vld [vmem:[%s369_s2] sm:$0xff] }
  0x2a   :  { %235 = vmatpush1.bf16.msra.mxu0 %v234_v37 }
  0x2b   :  { %237 = vmatprep.subr.bf16.mxu0 %v236_v38 }
  0x2e   :  { %239 = vmatpush1.bf16.msra.mxu0 %v238_v44 }
  0x2f   :  { %241 = vmatprep.subr.bf16.mxu0 %v240_v45 }
  0x32   :  { %243 = vmatpush1.bf16.msra.mxu0 %v242_v50 }
  0x33   :  { %245 = vmatprep.subr.bf16.mxu0 %v244_v51 }
  0x36   :  { %247 = vmatpush1.bf16.msra.mxu0 %v246_v56 }
  0x37   :  { %249 = vmatprep.subr.bf16.mxu0 %v248_v57 }
  0x3a   :  { %251 = vmatpush1.bf16.msra.mxu0 %v250_v62 }
  0x3b   :  { %253 = vmatprep.subr.bf16.mxu0 %v252_v63 }
  0x3e   :  { %255 = vmatpush1.bf16.msra.mxu0 %v254_v4 }
  0x3f   :  { %257 = vmatprep.subr.bf16.mxu0 %v256_v5 }
  0x42   :  { %259 = vmatpush1.bf16.msra.mxu0 %v258_v10 }
  0x43   :  { %261 = vmatprep.subr.bf16.mxu0 %v260_v11 }
  0x46   :  { %263 = vmatpush1.bf16.msra.mxu0 %v262_v16 }
  0x47   :  { %265 = vmatprep.subr.bf16.mxu0 %v264_v17 }
  0x4a   :  { %267 = vmatpush1.bf16.msra.mxu0 %v266_v22 }
  0x4b   :  { %269 = vmatprep.subr.bf16.mxu0 %v268_v23 }
  0x4e   :  { %271 = vmatpush1.bf16.msra.mxu0 %v270_v28 }
  0x4f   :  { %273 = vmatprep.subr.bf16.mxu0 %v272_v29 }
  0x52   :  { %275 = vmatpush1.bf16.msra.mxu0 %v274_v32 }
  0x55   :  { %161 = vmatmul.mubr.f32.vlgmr.msra.gmra.mrb[0].mxu0 %v30_v33 }
 0x128   :  { %v162_v37 = vpop.f32.mrb[0].mxu0 }
 0x129   :  { %v167_v38 = vmul.f32 %v162_v37, %v162_v37  ;;  %v164_v39 = vpop.f32.mrb[1].mxu0 }
 0x12a   :  { %v168_v40 = vmul.f32 %v164_v39, %v164_v39 }
 0x12c   :  { %v169_v41 = vadd.f32 %v168_v40, %v167_v38 }
 0x12e   :  { %v173_v42 = vsel %vm172_vm0, %v169_v41, -inf }
 0x12f   :  { %174 = vmax.xlane.f32.xlu0 %v173_v42 }
 0x145   :  { %195 = vperm.xlu0 %282, %v193_v43  }
 0x1bc   :  { %v175_v44 = vpop.xlane.xlu0 %174 }
 0x1bd   :  { %v184_v45 = vsub.f32 %v169_v41, %v175_v44  ;;  %vm176_vm1 = vcmp.eq.f32.partialorder %v173_v42, %v175_v44 }
 0x1be   :  { %v178_v51 = vsel %vm176_vm1, %v177_v49, 128.0 }
 0x1bf   :  { %v185_v46 = vmul.f32 1.442695, %v184_v45 }
 0x1c1   :  { %283 = vpow2.f32 %v185_v46 }
 0x1c4   :  { %v196_v50 = vpop.permute.xlu0 %195 }
 0x1c5   :  { %vm197_vm2 = vcmp.eq.s32.totalorder %v171_v36, %v196_v50 }
 0x1c6   :  { %v198_v52 = vsel %vm197_vm2, %v169_v41, 0.0 }
 0x1cb   :  { %v284_v47 = vpop.eup %283 }
 0x1cc   :  { %v187_v48 = vsel %vm172_vm0, %v284_v47, 0.0 }
 0x1cd   :  { %188 = vadd.xlane.f32.xlu1 %v187_v48 }
 0x1d1   :  { %179 = vmin.xlane.f32.xlu1 %v178_v51 }
 0x1d5   :  { %199 = vadd.xlane.f32.xlu1 %v198_v52 }
 0x25a   :  { %v189_v53 = vpop.xlane.xlu1 %188 }
 0x25b   :  { %285 = vlog2.f32 %v189_v53 }
 0x25e   :  { %v180_v54 = vpop.xlane.xlu1 %179 }
 0x25f   :  { %v276_v55 = vtrunc.f32 %v180_v54 }
 0x261   :  { %v277_v56 = vcvt.f32.s32 %v276_v55 }
 0x262   :  { %v200_v60 = vpop.xlane.xlu1 %199 }
 0x263   :  { %183 = vst.msk [vmem:[%s371_s4] sm:$0xff] %vm182_vm3, %v277_v56 }
 0x265   :  { %v286_v57 = vpop.eup %285 }
 0x266   :  { %v191_v58 = vmul.f32 0.6931472, %v286_v57 }
 0x268   :  { %v192_v59 = vadd.f32 %v191_v58, %v175_v44 }
 0x26a   :  { %v201_v61 = vsub.f32 %v192_v59, %v200_v60 }
 0x26c   :  { %202 = vst.msk [vmem:[%s370_s3] sm:$0xff] %vm182_vm3, %v201_v61 }
 0x26d   :  { %211 = vsyncpa [#allocation3], 1 }

</bundles_post_ra>
